<compile_context>
chip_gen: v5e
topology: v5e:2x2
jax: 0.10.0
libtpu: 0.0.40
codegen_flags: <defaults>
</compile_context>

<pallas_src>
import jax
import jax.numpy as jnp
from jax.experimental import pallas as pl
from jax.experimental.pallas import tpu as pltpu


def dqn_kernel(x_ref, w1_ref, b1_ref, w2_ref, b2_ref, out_ref):
    # fc1 + ReLU: MXU matmul with f32 accumulate, bias + relu on the VPU.
    h = jnp.dot(x_ref[...], w1_ref[...], preferred_element_type=jnp.float32)
    h = jnp.maximum(h + b1_ref[...], 0.0)      # (TB, H_pad), b1 broadcasts
    # fc2: keep the f32 accumulator (no downcast before the dot).
    y = jnp.dot(h, w2_ref[...], preferred_element_type=jnp.float32)
    out_ref[...] = (y + b2_ref[...]).astype(out_ref.dtype)   # (TB, O)


def _round_up(n, m):
    return ((n + m - 1) // m) * m


def _cdiv(a, b):
    return -(-a // b)


def pad_dqn_params(w1, b1, w2, b2):
    """Pad ONLY the hidden (lane) dim of the params to a multiple of 128.

    Call this once at init and reuse the result; zero padding is exact
    through the ReLU (padded hidden columns stay 0 and contribute nothing).
    """
    K, H = w1.shape
    O = w2.shape[1]
    H_pad = _round_up(H, 128)
    w1p = jnp.zeros((K, H_pad), w1.dtype).at[:, :H].set(w1)
    b1p = jnp.zeros((1, H_pad), b1.dtype).at[:, :H].set(b1.reshape(1, H))
    w2p = jnp.zeros((H_pad, O), w2.dtype).at[:H, :].set(w2)
    b2p = b2.reshape(1, O)
    return w1p, b1p, w2p, b2p


def dqn_forward(x, w1p, b1p, w2p, b2p, *, block_b=2048):
    """x: (B, inputs) unpadded; padded params from pad_dqn_params().
    Returns (B, outputs)."""
    B, K = x.shape
    H_pad = w1p.shape[1]
    O = w2p.shape[1]
    dt = x.dtype

    # Batch tiling: rows per tile is a multiple of 8 sublanes.  If more than
    # one tile is needed, force an even number of grid steps so v7x's two
    # TensorCores split the "parallel" batch axis evenly.
    TB0 = min(block_b, _round_up(B, 8))
    n_tiles = _cdiv(B, TB0)
    if n_tiles % 2 == 1 and B >= 16:
        n_tiles += 1
    TB = _round_up(_cdiv(B, n_tiles), 8)
    B_pad = n_tiles * TB

    # Only the batch rows ever get padded (cheap); K and O stay unpadded.
    xp = x if B_pad == B else jnp.zeros((B_pad, K), dt).at[:B].set(x)

    itemsize = jnp.dtype(dt).itemsize
    flops = 2 * B * (K * H_pad + H_pad * O)
    bytes_accessed = itemsize * (
        B * K                      # x in (unpadded)
        + K * H_pad + H_pad        # w1 + b1 (resident, read once)
        + H_pad * O + O            # w2 + b2
        + B * O                    # out (unpadded)
    )

    out_padded = pl.pallas_call(
        dqn_kernel,
        out_shape=jax.ShapeDtypeStruct((B_pad, O), dt),
        grid=(n_tiles,),
        in_specs=[
            # x: one batch tile per grid step; last dim is the full K extent.
            # (If a profile ever shows exposed input DMA at ramp-up, add
            #  pipeline_mode=pl.Buffered(3) here only.)
            pl.BlockSpec((TB, K), lambda i: (i, 0)),
            # Weights / biases: constant index_map -> DMA'd once, stay
            # resident in VMEM across all grid steps.
            pl.BlockSpec((K, H_pad), lambda i: (0, 0)),
            pl.BlockSpec((1, H_pad), lambda i: (0, 0)),
            pl.BlockSpec((H_pad, O), lambda i: (0, 0)),
            pl.BlockSpec((1, O), lambda i: (0, 0)),
        ],
        # Output block spans the full (unpadded) O extent -> contiguous HBM
        # writeback, no 64x padded write + slice pass.
        out_specs=pl.BlockSpec((TB, O), lambda i: (i, 0)),
        compiler_params=pltpu.CompilerParams(
            dimension_semantics=("parallel",),  # v7x: shard batch over 2 TCs
        ),
        cost_estimate=pl.CostEstimate(
            flops=flops, transcendentals=0, bytes_accessed=bytes_accessed),
    )(xp, w1p, b1p, w2p, b2p)

    return out_padded if B_pad == B else out_padded[:B]


def init_dqn_params(key, inputs, hidden, outputs, dtype=jnp.float32):
    """Deterministic init mimicking PyTorch nn.Linear default:
       U(-1/sqrt(fan_in), 1/sqrt(fan_in)) for both weight and bias."""
    k1, k2, k3, k4 = jax.random.split(key, 4)
    bound1 = 1.0 / jnp.sqrt(jnp.float32(inputs))
    bound2 = 1.0 / jnp.sqrt(jnp.float32(hidden))
    w1 = jax.random.uniform(k1, (inputs, hidden), dtype, -bound1, bound1)
    b1 = jax.random.uniform(k2, (1, hidden), dtype, -bound1, bound1)
    w2 = jax.random.uniform(k3, (hidden, outputs), dtype, -bound2, bound2)
    b2 = jax.random.uniform(k4, (1, outputs), dtype, -bound2, bound2)
    return w1, b1, w2, b2


if __name__ == "__main__":
    # CartPole-like sizes: 4 observation features, 32 hidden units, 2 actions.
    # TODO(synk): at these tiny sizes plain XLA fusion beats any Pallas kernel;
    # the tiling here pays off once B (replay minibatch / vector env) is large.
    batch, inputs, hidden, outputs = 2, 4, 32, 2

    key = jax.random.PRNGKey(0)
    kx, kp = jax.random.split(key)
    x = jax.random.normal(kx, (batch, inputs), jnp.float32)
    w1, b1, w2, b2 = init_dqn_params(kp, inputs, hidden, outputs)

    # Pad params ONCE (hoisted out of the forward pass).
    params = pad_dqn_params(w1, b1, w2, b2)

    out = jax.block_until_ready(dqn_forward(x, *params))

    # Pure-JAX reference of the same semantics.
    ref = jnp.maximum(x @ w1 + b1, 0.0) @ w2 + b2
    assert out.shape == (batch, outputs)
    assert jnp.allclose(out, ref, atol=1e-5, rtol=1e-5)

    # Also exercise the multi-tile path: B=1500 -> 2 tiles of 752 rows
    # (even grid length for v7x's two TensorCores).
    big_b = 1500
    xb = jax.random.normal(jax.random.PRNGKey(1), (big_b, inputs), jnp.float32)
    out_big = jax.block_until_ready(dqn_forward(xb, *params))
    ref_big = jnp.maximum(xb @ w1 + b1, 0.0) @ w2 + b2
    assert out_big.shape == (big_b, outputs)
    assert jnp.allclose(out_big, ref_big, atol=1e-4, rtol=1e-4)

    print("KERNEL_OK")
</pallas_src>

<mosaic_0001>
module attributes {stable_mosaic.version = 11 : i64} {
  func.func @dqn_kernel(%arg0: i32, %arg1: memref<8x4xf32, #tpu.memory_space<vmem>>, %arg2: memref<4x128xf32, #tpu.memory_space<vmem>>, %arg3: memref<1x128xf32, #tpu.memory_space<vmem>>, %arg4: memref<128x2xf32, #tpu.memory_space<vmem>>, %arg5: memref<1x2xf32, #tpu.memory_space<vmem>>, %arg6: memref<8x2xf32, #tpu.memory_space<vmem>>) attributes {dimension_semantics = [#tpu.dimension_semantics<parallel>], iteration_bounds = array<i64: 1>, scalar_prefetch = 0 : i64, scratch_operands = 0 : i64, tpu.core_type = #tpu.core_type<tc>, window_params = [{transform_indices = @transform_0, window_bounds = array<i64: 8, 4>}, {pipeline_mode = #tpu.pipeline_mode<synchronous>, transform_indices = @transform_1, window_bounds = array<i64: 4, 128>}, {pipeline_mode = #tpu.pipeline_mode<synchronous>, transform_indices = @transform_2, window_bounds = array<i64: 1, 128>}, {pipeline_mode = #tpu.pipeline_mode<synchronous>, transform_indices = @transform_3, window_bounds = array<i64: 128, 2>}, {pipeline_mode = #tpu.pipeline_mode<synchronous>, transform_indices = @transform_4, window_bounds = array<i64: 1, 2>}, {transform_indices = @transform_5, window_bounds = array<i64: 8, 2>}]} {
    %c0 = arith.constant 0 : index
    %c0_0 = arith.constant 0 : index
    %0 = vector.load %arg1[%c0, %c0_0] : memref<8x4xf32, #tpu.memory_space<vmem>>, vector<8x4xf32>
    %c0_1 = arith.constant 0 : index
    %c0_2 = arith.constant 0 : index
    %1 = vector.load %arg2[%c0_1, %c0_2] : memref<4x128xf32, #tpu.memory_space<vmem>>, vector<4x128xf32>
    %cst = arith.constant dense<0.000000e+00> : vector<8x128xf32>
    %2 = tpu.matmul %0, %1, %cst {dimension_numbers = #tpu.dot_dimension_numbers<[1], [0], [0], [1], [0, 0, 1, 1], [], []>} : vector<8x4xf32>, vector<4x128xf32>, vector<8x128xf32> -> vector<8x128xf32>
    %c0_3 = arith.constant 0 : index
    %c0_4 = arith.constant 0 : index
    %3 = vector.load %arg3[%c0_3, %c0_4] : memref<1x128xf32, #tpu.memory_space<vmem>>, vector<1x128xf32>
    %4 = vector.broadcast %3 : vector<1x128xf32> to vector<8x128xf32>
    %5 = arith.addf %2, %4 : vector<8x128xf32>
    %cst_5 = arith.constant 0.000000e+00 : f32
    %6 = vector.broadcast %cst_5 : f32 to vector<8x128xf32>
    %7 = arith.maximumf %5, %6 : vector<8x128xf32>
    %c0_6 = arith.constant 0 : index
    %c0_7 = arith.constant 0 : index
    %8 = vector.load %arg4[%c0_6, %c0_7] : memref<128x2xf32, #tpu.memory_space<vmem>>, vector<128x2xf32>
    %cst_8 = arith.constant dense<0.000000e+00> : vector<8x2xf32>
    %9 = tpu.matmul %7, %8, %cst_8 {dimension_numbers = #tpu.dot_dimension_numbers<[1], [0], [0], [1], [0, 0, 1, 1], [], []>} : vector<8x128xf32>, vector<128x2xf32>, vector<8x2xf32> -> vector<8x2xf32>
    %c0_9 = arith.constant 0 : index
    %c0_10 = arith.constant 0 : index
    %10 = vector.load %arg5[%c0_9, %c0_10] : memref<1x2xf32, #tpu.memory_space<vmem>>, vector<1x2xf32>
    %11 = vector.broadcast %10 : vector<1x2xf32> to vector<8x2xf32>
    %12 = arith.addf %9, %11 : vector<8x2xf32>
    %c0_11 = arith.constant 0 : index
    %c0_12 = arith.constant 0 : index
    %13 = vector.load %arg6[%c0_11, %c0_12] : memref<8x2xf32, #tpu.memory_space<vmem>>, vector<8x2xf32>
    tpu.vector_store %arg6[%c0_11, %c0_12], %12 {strides = array<i32>} : memref<8x2xf32, #tpu.memory_space<vmem>>, vector<8x2xf32>,
    return
  }
  func.func @transform_0(%arg0: i32) -> (i32, i32) {
    %c0_i32 = arith.constant 0 : i32
    %c0_i32_0 = arith.constant 0 : i32
    return %arg0, %c0_i32 : i32, i32
  }
  func.func @transform_1(%arg0: i32) -> (i32, i32) {
    %c0_i32 = arith.constant 0 : i32
    %c0_i32_0 = arith.constant 0 : i32
    %c0_i32_1 = arith.constant 0 : i32
    return %c0_i32, %c0_i32_0 : i32, i32
  }
  func.func @transform_2(%arg0: i32) -> (i32, i32) {
    %c0_i32 = arith.constant 0 : i32
    %c0_i32_0 = arith.constant 0 : i32
    %c0_i32_1 = arith.constant 0 : i32
    return %c0_i32, %c0_i32_0 : i32, i32
  }
  func.func @transform_3(%arg0: i32) -> (i32, i32) {
    %c0_i32 = arith.constant 0 : i32
    %c0_i32_0 = arith.constant 0 : i32
    %c0_i32_1 = arith.constant 0 : i32
    return %c0_i32, %c0_i32_0 : i32, i32
  }
  func.func @transform_4(%arg0: i32) -> (i32, i32) {
    %c0_i32 = arith.constant 0 : i32
    %c0_i32_0 = arith.constant 0 : i32
    %c0_i32_1 = arith.constant 0 : i32
    return %c0_i32, %c0_i32_0 : i32, i32
  }
  func.func @transform_5(%arg0: i32) -> (i32, i32) {
    %c0_i32 = arith.constant 0 : i32
    %c0_i32_0 = arith.constant 0 : i32
    return %arg0, %c0_i32 : i32, i32
  }
}

</mosaic_0001>

<bundles_post_ra>
// kernel: tpu_custom_call.1
= control target key start
LH: loop header
LB: loop body
LE: loop exit
PB: predicated region body
PF: predicated region fallthrough
CT: control target
= control target key end

     0   :  { %vm30_vm0 = vcmask 1043456   ;;  %vm26_vm1 = vcmask 31744   ;;  %vm95_vm2 = vcmask 15360   ;;  %s198_s1 = inlined_call_operand.vmem [shape: f32[4,128], index: 1, kind: input, shape index: {}]   ;;  %s199_s0 = inlined_call_operand.vmem [shape: f32[8,4], index: 0, kind: input, shape index: {}]   ;;  %s200_s3 = inlined_call_operand.vmem [shape: f32[128,2], index: 3, kind: input, shape index: {}]   ;;  %s201_s2 = inlined_call_operand.vmem [shape: f32[1,128], index: 2, kind: input, shape index: {}]   ;;  %s202_s4 = inlined_call_operand.vmem [shape: f32[1,2], index: 4, kind: input, shape index: {}]   ;;  %s203_s5 = inlined_call_operand.vmem [shape: f32[8,2], index: 5, kind: output, shape index: {}]  }
   0x1   :  { %v21_v0 = vld [vmem:[%s198_s1] sm:$0xf]  ;;  %v70_v2 = vld [vmem:[%s200_s3 + $0x78] sm:$0xff]  ;;  %v69_v3 = vld [vmem:[%s200_s3 + $0x70] sm:$0xff] }
   0x2   :  { %v20_v1 = vld [vmem:[%s199_s0] sm:$0xff]  ;;  %101 = vmatpush.msk.msra.mxu0 %vm30_vm0, %v21_v0  ;;  %75 = vmatpush.msra.mxu1 %v70_v2  ;;  %v68_v4 = vld [vmem:[%s200_s3 + $0x68] sm:$0xff]  ;;  %v66_v6 = vld [vmem:[%s200_s3 + $0x58] sm:$0xff] }
   0x3   :  { %102 = vmatmul.msk.f32.vlgmr.msra.gmra.mxu0 %vm26_vm1, %v20_v1  ;;  %v67_v5 = vld [vmem:[%s200_s3 + $0x60] sm:$0xff]  ;;  %v65_v7 = vld [vmem:[%s200_s3 + $0x50] sm:$0xff]  ;;  %v64_v8 = vld [vmem:[%s200_s3 + $0x48] sm:$0xff] }
   0x4   :  { %76 = vmatpush.msra.mxu1 %v69_v3  ;;  %v63_v9 = vld [vmem:[%s200_s3 + $0x40] sm:$0xff]  ;;  %v62_v10 = vld [vmem:[%s200_s3 + $0x38] sm:$0xff]  ;;  %v61_v11 = vld [vmem:[%s200_s3 + $0x30] sm:$0xff] }
   0x5   :  { %v60_v12 = vld [vmem:[%s200_s3 + $0x28] sm:$0xff]  ;;  %v59_v13 = vld [vmem:[%s200_s3 + $0x20] sm:$0xff]  ;;  %v58_v14 = vld [vmem:[%s200_s3 + $0x18] sm:$0xff] }
   0x6   :  { %77 = vmatpush.msra.mxu1 %v68_v4  ;;  %v57_v15 = vld [vmem:[%s200_s3 + $0x10] sm:$0xff]  ;;  %v56_v16 = vld [vmem:[%s200_s3 + $0x8] sm:$0xff]  ;;  %v55_v17 = vld [vmem:[%s200_s3] sm:$0xff] }
   0x7   :  { %v103_v18 = vld [vmem:[%s201_s2] ss:$0 sm:$0xff] }
   0x8   :  { %78 = vmatpush.msra.mxu1 %v67_v5  ;;  %v104_v22 = vld [vmem:[%s202_s4] ss:$0 sm:$0xff] }
   0xa   :  { %79 = vmatpush.msra.mxu1 %v66_v6 }
   0xc   :  { %80 = vmatpush.msra.mxu1 %v65_v7 }
   0xe   :  { %81 = vmatpush.msra.mxu1 %v64_v8 }
  0x10   :  { %82 = vmatpush.msra.mxu1 %v63_v9 }
  0x12   :  { %83 = vmatpush.msra.mxu1 %v62_v10 }
  0x14   :  { %84 = vmatpush.msra.mxu1 %v61_v11 }
  0x16   :  { %85 = vmatpush.msra.mxu1 %v60_v12 }
  0x18   :  { %86 = vmatpush.msra.mxu1 %v59_v13 }
  0x1a   :  { %87 = vmatpush.msra.mxu1 %v58_v14 }
  0x1c   :  { %88 = vmatpush.msra.mxu1 %v57_v15 }
  0x1e   :  { %89 = vmatpush.msra.mxu1 %v56_v16 }
  0x20   :  { %90 = vmatpush.msra.mxu1 %v55_v17 }
  0x80   :  { %v51_v19 = vpop.f32.mrf.mxu0 }
  0x81   :  { %v52_v20 = vadd.f32 %v103_v18, %v51_v19 }
  0x83   :  { %v54_v21 = vmax.f32 %v52_v20, 0.0 }
  0x85   :  { %91 = vmatmul.f32.vlgmr.msra.gmra.mxu1 %v54_v21 }
 0x102   :  { %v92_v23 = vpop.f32.mrf.mxu1 }
 0x103   :  { %v93_v24 = vadd.f32 %v104_v22, %v92_v23 }
 0x105   :  { %96 = vst.msk [vmem:[%s203_s5] sm:$0xff] %vm95_vm2, %v93_v24 }

</bundles_post_ra>
